<compile_context>
chip_gen: v7x
topology: tpu7x:2x2x1
jax: 0.10.0
libtpu: 0.0.40
codegen_flags: <defaults>
</compile_context>

<pallas_src>
import functools
import math

import numpy as np
import jax
import jax.numpy as jnp
from jax import lax
from jax.experimental import pallas as pl
from jax.experimental.pallas import tpu as pltpu


# ----------------------------- plain-JAX glue: build cir1 ----------------------------- #

def _rz(theta):
    return np.array([[np.exp(-0.5j * theta), 0.0],
                     [0.0, np.exp(0.5j * theta)]], dtype=np.complex64)


def _ry(theta):
    c, s = np.cos(theta / 2.0), np.sin(theta / 2.0)
    return np.array([[c, -s],
                     [s,  c]], dtype=np.complex64)


def _kron_list(mats):
    out = mats[0]
    for m in mats[1:]:
        out = np.kron(out, m)
    return out


def _cnot_full(control, target, nq):
    """Full CNOT unitary on nq qubits, qubit 0 = MSB."""
    dim = 2 ** nq
    idx = np.arange(dim)
    cbit = (idx >> (nq - 1 - control)) & 1
    out = idx ^ (cbit << (nq - 1 - target))
    P = np.zeros((dim, dim), dtype=np.complex64)
    P[out, idx] = 1.0
    return P


def build_psi1(n):
    """psi1 = U_cir1 @ |0...0> for cir1 = Rz-layer; Ry-layer; Rz-layer; CNOT(0,1); CNOT(1,2)."""
    nq = n + 1
    # deterministic "learned" rotation angles (stand-in for the nn.Parameter init)
    theta_z1 = 0.1 + 0.1 * np.arange(nq)
    theta_y = 0.2 + 0.1 * np.arange(nq)
    theta_z2 = 0.3 + 0.1 * np.arange(nq)

    U = _kron_list([_rz(t) for t in theta_z1])
    U = _kron_list([_ry(t) for t in theta_y]) @ U
    U = _kron_list([_rz(t) for t in theta_z2]) @ U
    U = _cnot_full(0, 1, nq) @ U
    U = _cnot_full(1, 2, nq) @ U
    psi1 = U[:, 0]  # initial state is e_0
    return jnp.asarray(psi1.real, jnp.float32), jnp.asarray(psi1.imag, jnp.float32)


# --------------------------------- Pallas kernel --------------------------------- #

def _round_up(x, m):
    return ((x + m - 1) // m) * m


@functools.partial(jax.jit, static_argnames=("block_b",))
def dj_forward(oracle_r, oracle_i, psi_r, psi_i, block_b=8192):
    """oracle_{r,i}: (B, D, D) float32; psi_{r,i}: (D,) float32 -> logits (B, 2) float32."""
    B, D, _ = oracle_r.shape

    # Lane-dense batch tile: always a multiple of 128; capped at ceil(B/2) (rounded up) so the
    # grid has >= 2 steps whenever possible -> both v7x TensorCores are used.  Default 8192
    # gives two 1 MiB input blocks per grid step (4 MiB double-buffered) on large batches.
    bt = min(_round_up(block_b, 128), _round_up(pl.cdiv(B, 2), 128))
    bt = max(bt, 128)
    b_pad = _round_up(B, bt)
    grid = b_pad // bt

    # Only oracle rows D-2, D-1 ever contribute (X-layer index folding).  One fused
    # slice+reshape+pad+transpose copy per input (no concat): (B, D, D) -> (2D, b_pad).
    def pack(o):
        a = o[:, D - 2:D, :].reshape(B, 2 * D)      # [row D-2 | row D-1] per oracle
        if b_pad != B:
            a = jnp.pad(a, ((0, b_pad - B), (0, 0)))
        return a.T                                   # (2D, b_pad): batch on the lane axis

    ar = pack(oracle_r)
    ai = pack(oracle_i)

    pr = psi_r.reshape(D, 1).astype(jnp.float32)
    pi = psi_i.reshape(D, 1).astype(jnp.float32)

    # Strip-mine the lane axis inside the kernel so vreg live ranges stay bounded at large bt.
    strip = math.gcd(bt, 512)          # 128 / 256 / 512, always divides bt
    n_strips = bt // strip

    def kernel(pr_ref, pi_ref, ar_ref, ai_ref, out_ref):
        # Hoisted broadcasts of psi1 (loop-invariant; JAX does not CSE broadcast_in_dim).
        prc = jnp.broadcast_to(pr_ref[...], (D, strip))
        pic = jnp.broadcast_to(pi_ref[...], (D, strip))

        def body(s, carry):
            off = pl.multiple_of(s * strip, strip)
            ar0 = ar_ref[pl.ds(0, D), pl.ds(off, strip)]      # Re(row D-2)   (D, strip)
            ar1 = ar_ref[pl.ds(D, D), pl.ds(off, strip)]      # Re(row D-1)
            ai0 = ai_ref[pl.ds(0, D), pl.ds(off, strip)]      # Im(row D-2)
            ai1 = ai_ref[pl.ds(D, D), pl.ds(off, strip)]      # Im(row D-1)

            # exact-f32 complex dot of the two rows with psi1 (VPU mul + sublane reduce)
            vr0 = jnp.sum(ar0 * prc - ai0 * pic, axis=0, keepdims=True)   # (1, strip)
            vi0 = jnp.sum(ar0 * pic + ai0 * prc, axis=0, keepdims=True)
            vr1 = jnp.sum(ar1 * prc - ai1 * pic, axis=0, keepdims=True)
            vi1 = jnp.sum(ar1 * pic + ai1 * prc, axis=0, keepdims=True)

            # x = |v[D-2]|^2 + |v[D-1]|^2 ; lane-dense (multiple-of-128) unmasked store
            out_ref[:, pl.ds(off, strip)] = vr0 * vr0 + vi0 * vi0 + vr1 * vr1 + vi1 * vi1
            return carry

        lax.fori_loop(0, n_strips, body, 0, unroll=True)

    x_pad = pl.pallas_call(
        kernel,
        out_shape=jax.ShapeDtypeStruct((1, b_pad), jnp.float32),
        grid_spec=pltpu.PrefetchScalarGridSpec(
            num_scalar_prefetch=0,
            grid=(grid,),
            in_specs=[
                pl.BlockSpec((D, 1), lambda g: (0, 0)),        # psi real (tiny, resident)
                pl.BlockSpec((D, 1), lambda g: (0, 0)),        # psi imag
                pl.BlockSpec((2 * D, bt), lambda g: (0, g)),   # Re rows, batch on lanes
                pl.BlockSpec((2 * D, bt), lambda g: (0, g)),   # Im rows, batch on lanes
            ],
            out_specs=pl.BlockSpec((1, bt), lambda g: (0, g)),
        ),
        compiler_params=pltpu.CompilerParams(dimension_semantics=("parallel",)),
    )(pr, pi, ar, ai)

    x = x_pad.reshape(b_pad)[:B]
    # logits assembly is trivial XLA glue; keeping it outside keeps the kernel store lane-dense.
    return jnp.stack([x, 1.0 - x], axis=-1)


# --------------------------------- reference --------------------------------- #

def dj_forward_ref(oracle_r, oracle_i, psi_r, psi_i):
    D = psi_r.shape[0]
    U = oracle_r + 1j * oracle_i
    psi = psi_r + 1j * psi_i
    v = jnp.einsum('bij,j->bi', U, psi)
    prob = jnp.abs(v) ** 2
    x = prob[:, D - 2] + prob[:, D - 1]
    return jnp.stack([x, 1.0 - x], axis=-1)


# ----------------------------------- main ----------------------------------- #

if __name__ == "__main__":
    n = 3                 # n data qubits + 1 ancilla
    D = 2 ** (n + 1)      # 16
    B = 300               # batch of oracles (exercises padding + a 2-step grid)

    psi_r, psi_i = build_psi1(n)

    key = jax.random.PRNGKey(0)
    kr, ki = jax.random.split(key)
    oracle_r = jax.random.normal(kr, (B, D, D), dtype=jnp.float32)
    oracle_i = jax.random.normal(ki, (B, D, D), dtype=jnp.float32)

    # Default block_b=8192: at this demo size bt is capped at ceil(B/2) rounded to 128 (=256),
    # giving a 2-step grid; at large B it yields ~1 MiB per-input blocks per grid step.
    logits = dj_forward(oracle_r, oracle_i, psi_r, psi_i)
    logits = jax.block_until_ready(logits)

    ref = dj_forward_ref(oracle_r, oracle_i, psi_r, psi_i)
    assert logits.shape == (B, 2)
    assert jnp.allclose(logits, ref, rtol=1e-4, atol=1e-4), (logits, ref)

    print("KERNEL_OK")
</pallas_src>

<mosaic_0001>
module attributes {stable_mosaic.version = 11 : i64} {
  func.func @kernel(%arg0: i32, %arg1: memref<16x1xf32, #tpu.memory_space<vmem>>, %arg2: memref<16x1xf32, #tpu.memory_space<vmem>>, %arg3: memref<32x256xf32, #tpu.memory_space<vmem>>, %arg4: memref<32x256xf32, #tpu.memory_space<vmem>>, %arg5: memref<1x256xf32, #tpu.memory_space<vmem>>) attributes {dimension_semantics = [#tpu.dimension_semantics<parallel>], iteration_bounds = array<i64: 2>, scalar_prefetch = 0 : i64, scratch_operands = 0 : i64, tpu.core_type = #tpu.core_type<tc>, window_params = [{pipeline_mode = #tpu.pipeline_mode<synchronous>, transform_indices = @transform_0, window_bounds = array<i64: 16, 1>}, {pipeline_mode = #tpu.pipeline_mode<synchronous>, transform_indices = @transform_1, window_bounds = array<i64: 16, 1>}, {transform_indices = @transform_2, window_bounds = array<i64: 32, 256>}, {transform_indices = @transform_3, window_bounds = array<i64: 32, 256>}, {transform_indices = @transform_4, window_bounds = array<i64: 1, 256>}]} {
    %c0 = arith.constant 0 : index
    %c0_0 = arith.constant 0 : index
    %0 = vector.load %arg1[%c0, %c0_0] : memref<16x1xf32, #tpu.memory_space<vmem>>, vector<16x1xf32>
    %1 = vector.shape_cast %0 : vector<16x1xf32> to vector<16x1xf32>
    %2 = vector.broadcast %1 : vector<16x1xf32> to vector<16x256xf32>
    %c0_1 = arith.constant 0 : index
    %c0_2 = arith.constant 0 : index
    %3 = vector.load %arg2[%c0_1, %c0_2] : memref<16x1xf32, #tpu.memory_space<vmem>>, vector<16x1xf32>
    %4 = vector.shape_cast %3 : vector<16x1xf32> to vector<16x1xf32>
    %5 = vector.broadcast %4 : vector<16x1xf32> to vector<16x256xf32>
    %c0_i32 = arith.constant 0 : i32
    %c256_i32 = arith.constant 256 : i32
    %6 = arith.muli %c0_i32, %c256_i32 : i32
    %7 = tpu.assume_multiple %6, 256 : i32
    %c0_3 = arith.constant 0 : index
    %8 = arith.index_cast %7 : i32 to index
    %9 = vector.load %arg3[%c0_3, %8] : memref<32x256xf32, #tpu.memory_space<vmem>>, vector<16x256xf32>
    %c16 = arith.constant 16 : index
    %10 = arith.index_cast %7 : i32 to index
    %11 = vector.load %arg3[%c16, %10] : memref<32x256xf32, #tpu.memory_space<vmem>>, vector<16x256xf32>
    %c0_4 = arith.constant 0 : index
    %12 = arith.index_cast %7 : i32 to index
    %13 = vector.load %arg4[%c0_4, %12] : memref<32x256xf32, #tpu.memory_space<vmem>>, vector<16x256xf32>
    %c16_5 = arith.constant 16 : index
    %14 = arith.index_cast %7 : i32 to index
    %15 = vector.load %arg4[%c16_5, %14] : memref<32x256xf32, #tpu.memory_space<vmem>>, vector<16x256xf32>
    %16 = arith.mulf %9, %2 : vector<16x256xf32>
    %17 = arith.mulf %13, %5 : vector<16x256xf32>
    %18 = arith.subf %16, %17 : vector<16x256xf32>
    %cst = arith.constant dense<0.000000e+00> : vector<256xf32>
    %19 = vector.multi_reduction <add>, %18, %cst [0] : vector<16x256xf32> to vector<256xf32>
    %20 = vector.shape_cast %19 : vector<256xf32> to vector<1x256xf32>
    %21 = arith.mulf %9, %5 : vector<16x256xf32>
    %22 = arith.mulf %13, %2 : vector<16x256xf32>
    %23 = arith.addf %21, %22 : vector<16x256xf32>
    %cst_6 = arith.constant dense<0.000000e+00> : vector<256xf32>
    %24 = vector.multi_reduction <add>, %23, %cst_6 [0] : vector<16x256xf32> to vector<256xf32>
    %25 = vector.shape_cast %24 : vector<256xf32> to vector<1x256xf32>
    %26 = arith.mulf %11, %2 : vector<16x256xf32>
    %27 = arith.mulf %15, %5 : vector<16x256xf32>
    %28 = arith.subf %26, %27 : vector<16x256xf32>
    %cst_7 = arith.constant dense<0.000000e+00> : vector<256xf32>
    %29 = vector.multi_reduction <add>, %28, %cst_7 [0] : vector<16x256xf32> to vector<256xf32>
    %30 = vector.shape_cast %29 : vector<256xf32> to vector<1x256xf32>
    %31 = arith.mulf %11, %5 : vector<16x256xf32>
    %32 = arith.mulf %15, %2 : vector<16x256xf32>
    %33 = arith.addf %31, %32 : vector<16x256xf32>
    %cst_8 = arith.constant dense<0.000000e+00> : vector<256xf32>
    %34 = vector.multi_reduction <add>, %33, %cst_8 [0] : vector<16x256xf32> to vector<256xf32>
    %35 = vector.shape_cast %34 : vector<256xf32> to vector<1x256xf32>
    %36 = arith.mulf %20, %20 : vector<1x256xf32>
    %37 = arith.mulf %25, %25 : vector<1x256xf32>
    %38 = arith.addf %36, %37 : vector<1x256xf32>
    %39 = arith.mulf %30, %30 : vector<1x256xf32>
    %40 = arith.addf %38, %39 : vector<1x256xf32>
    %41 = arith.mulf %35, %35 : vector<1x256xf32>
    %42 = arith.addf %40, %41 : vector<1x256xf32>
    %c0_9 = arith.constant 0 : index
    %43 = arith.index_cast %7 : i32 to index
    %44 = vector.load %arg5[%c0_9, %43] : memref<1x256xf32, #tpu.memory_space<vmem>>, vector<1x256xf32>
    tpu.vector_store %arg5[%c0_9, %43], %42 {strides = array<i32>} : memref<1x256xf32, #tpu.memory_space<vmem>>, vector<1x256xf32>,
    %c1_i32 = arith.constant 1 : i32
    return
  }
  func.func @transform_0(%arg0: i32) -> (i32, i32) {
    %c0_i32 = arith.constant 0 : i32
    %c0_i32_0 = arith.constant 0 : i32
    %c0_i32_1 = arith.constant 0 : i32
    return %c0_i32, %c0_i32_0 : i32, i32
  }
  func.func @transform_1(%arg0: i32) -> (i32, i32) {
    %c0_i32 = arith.constant 0 : i32
    %c0_i32_0 = arith.constant 0 : i32
    %c0_i32_1 = arith.constant 0 : i32
    return %c0_i32, %c0_i32_0 : i32, i32
  }
  func.func @transform_2(%arg0: i32) -> (i32, i32) {
    %c0_i32 = arith.constant 0 : i32
    %c0_i32_0 = arith.constant 0 : i32
    return %c0_i32, %arg0 : i32, i32
  }
  func.func @transform_3(%arg0: i32) -> (i32, i32) {
    %c0_i32 = arith.constant 0 : i32
    %c0_i32_0 = arith.constant 0 : i32
    return %c0_i32, %arg0 : i32, i32
  }
  func.func @transform_4(%arg0: i32) -> (i32, i32) {
    %c0_i32 = arith.constant 0 : i32
    %c0_i32_0 = arith.constant 0 : i32
    return %c0_i32, %arg0 : i32, i32
  }
}

</mosaic_0001>

<bundles_post_ra>
// kernel: dj_forward.1
= control target key start
LH: loop header
LB: loop body
LE: loop exit
PB: predicated region body
PF: predicated region fallthrough
CT: control target
= control target key end

     0   :  { %s639_s15 = smov 0   ;;  %s641_s16 = smov 0   ;;  %s731_s0 = inlined_call_operand.vmem [shape: f32[16,1], index: 0, kind: input, shape index: {}]   ;;  %s732_s1 = inlined_call_operand.vmem [shape: f32[16,1], index: 1, kind: input, shape index: {}]   ;;  %s733_s2 = inlined_call_operand.vmem [shape: f32[32,512], index: 2, kind: input, shape index: {}]   ;;  %s734_s3 = inlined_call_operand.vmem [shape: f32[32,512], index: 3, kind: input, shape index: {}]   ;;  %s735_s4 = inlined_call_operand.vmem [shape: f32[1,512], index: 4, kind: output, shape index: {}]  }
   0x1   :  { %s643_s17 = smov 0  }
   0x2 LB: > { %s542_s18 = sadd.s32 4294967295, %s610_s17   ;;  %s656_s19 = sadd.s32 1, %s610_s17   ;;  %s610_s17 = sphi %s643_s17, %s739_s17   ;;  %s606_s16 = sphi %s641_s16, %s738_s16   ;;  %s602_s15 = sphi %s639_s15, %s737_s15  }
   0x3   : > { %s60_s20 = ssub.s32 %s610_s17, %s656_s19  ;;  %s63_s21 = sadd.s32 1, %s606_s16 }
   0x4   : > { %p61_p0 = scmp.eq.s32.totalorder %s60_s20, 0  ;;  %p70_p1 = scmp.ne.s32.totalorder %s606_s16, %s602_s15 }
   0x5   : > { %p71_p2 = scmp.eq.s32.totalorder %s610_s17, 0  ;;  %p545_p4 = scmp.ge.s32.totalorder %s610_s17, 2 }
   0x6   : > { %s665_s22 = scalar_select %p61_p0, %s606_s16, %s63_s21  }
   0x7   : > { %p667_p3 = por %p71_p2, %p70_p1  ;;  %154 = sbr.rel (%p545_p4) target bundleno = 30 (0x1e), region = 24 }
   0xe   : > { %157 = sbr.rel (!%p667_p3) target bundleno = 22 (0x16), region = 28  ;;  %s159_s24 = sand.u32 (%p667_p3), 1, %s606_s16  }
   0xf   : > { %s558_s25 = sshll.u32 (%p667_p3), %s610_s17, 4  ;;  %s546_s26 = sshll.u32 (%p667_p3), %s159_s24, 6 }
  0x10   : > { %s164_s29 = scalar_lea.vmem (%p667_p3), %s733_s2, %s558_s25  ;;  %s161_s30 = scalar_lea.vmem (%p667_p3), [#allocation2], %s546_s26 }
  0x11   : > { %v177_v0 = vld [vmem:[%s164_s29] sm:$0xff] (%p667_p3)  ;;  %v179_v1 = vld [vmem:[%s164_s29 + $0x8] sm:$0xff] (%p667_p3) }
  0x12   : > { %v181_v2 = vld [vmem:[%s164_s29 + $0x20] sm:$0xff] (%p667_p3)  ;;  %178 = vst [vmem:[%s161_s30] sm:$0xff] (%p667_p3), %v177_v0  ;;  %180 = vst [vmem:[%s161_s30 + $0x8] sm:$0xff] (%p667_p3), %v179_v1  ;;  %v183_v3 = vld [vmem:[%s164_s29 + $0x28] sm:$0xff] (%p667_p3) }
  0x13   : > { %182 = vst [vmem:[%s161_s30 + $0x10] sm:$0xff] (%p667_p3), %v181_v2  ;;  %v185_v4 = vld [vmem:[%s164_s29 + $0x40] sm:$0xff] (%p667_p3)  ;;  %v187_v5 = vld [vmem:[%s164_s29 + $0x48] sm:$0xff] (%p667_p3)  ;;  %184 = vst [vmem:[%s161_s30 + $0x18] sm:$0xff] (%p667_p3), %v183_v3 }
  0x14   : > { %186 = vst [vmem:[%s161_s30 + $0x20] sm:$0xff] (%p667_p3), %v185_v4  ;;  %188 = vst [vmem:[%s161_s30 + $0x28] sm:$0xff] (%p667_p3), %v187_v5  ;;  %v189_v6 = vld [vmem:[%s164_s29 + $0x60] sm:$0xff] (%p667_p3)  ;;  %v191_v7 = vld [vmem:[%s164_s29 + $0x68] sm:$0xff] (%p667_p3) }
  0x15   : > { %190 = vst [vmem:[%s161_s30 + $0x30] sm:$0xff] %v189_v6  ;;  %192 = vst [vmem:[%s161_s30 + $0x38] sm:$0xff] %v191_v7 }
  0x16 PF: > { %198 = sbr.rel (!%p667_p3) target bundleno = 30 (0x1e), region = 51  ;;  %s200_s5 = sand.u32 (%p667_p3), 1, %s606_s16  }
  0x17   : > { %s559_s6 = sshll.u32 (%p667_p3), %s610_s17, 4  ;;  %s549_s7 = sshll.u32 (%p667_p3), %s200_s5, 6 }
  0x18   : > { %s205_s10 = scalar_lea.vmem (%p667_p3), %s734_s3, %s559_s6  ;;  %s202_s11 = scalar_lea.vmem (%p667_p3), [#allocation3], %s549_s7 }
  0x19   : > { %v218_v8 = vld [vmem:[%s205_s10] sm:$0xff] (%p667_p3)  ;;  %v220_v9 = vld [vmem:[%s205_s10 + $0x8] sm:$0xff] (%p667_p3) }
  0x1a   : > { %v222_v10 = vld [vmem:[%s205_s10 + $0x20] sm:$0xff] (%p667_p3)  ;;  %219 = vst [vmem:[%s202_s11] sm:$0xff] (%p667_p3), %v218_v8  ;;  %221 = vst [vmem:[%s202_s11 + $0x8] sm:$0xff] (%p667_p3), %v220_v9  ;;  %v224_v11 = vld [vmem:[%s205_s10 + $0x28] sm:$0xff] (%p667_p3) }
  0x1b   : > { %223 = vst [vmem:[%s202_s11 + $0x10] sm:$0xff] (%p667_p3), %v222_v10  ;;  %v226_v12 = vld [vmem:[%s205_s10 + $0x40] sm:$0xff] (%p667_p3)  ;;  %v228_v13 = vld [vmem:[%s205_s10 + $0x48] sm:$0xff] (%p667_p3)  ;;  %225 = vst [vmem:[%s202_s11 + $0x18] sm:$0xff] (%p667_p3), %v224_v11 }
  0x1c   : > { %227 = vst [vmem:[%s202_s11 + $0x20] sm:$0xff] (%p667_p3), %v226_v12  ;;  %229 = vst [vmem:[%s202_s11 + $0x28] sm:$0xff] (%p667_p3), %v228_v13  ;;  %v230_v14 = vld [vmem:[%s205_s10 + $0x60] sm:$0xff] (%p667_p3)  ;;  %v232_v15 = vld [vmem:[%s205_s10 + $0x68] sm:$0xff] (%p667_p3) }
  0x1d   : > { %231 = vst [vmem:[%s202_s11 + $0x30] sm:$0xff] %v230_v14  ;;  %233 = vst [vmem:[%s202_s11 + $0x38] sm:$0xff] %v232_v15 }
  0x1e PF: > { %p552_p5 = scmp.ge.s32.totalorder %s610_s17, 1  ;;  %p238_p6 = scmp.lt.s32.totalorder %s610_s17, 3 }
  0x20   : > { %p239_p7 = pnand %p552_p5, %p238_p6 }
  0x21   : > { %v299_v16 = vld [vmem:[%s732_s1] sm:$0xff] (!%p239_p7)  ;;  %v612_v18 = vmov (!%p239_p7), 0   ;;  %v300_v19 = vld [vmem:[%s732_s1 + $0x8] sm:$0xff] (!%p239_p7)  ;;  %s245_s26 = sand.u32 (!%p239_p7), 1, %s602_s15   ;;  %v613_v31 = vmov (!%p239_p7), 1966171168   ;;  %v451_v33 = vlaneseq (!%p239_p7) }
  0x22   : > { %242 = sbr.rel (%p239_p7) target bundleno = 205 (0xcd), region = 74  ;;  %v287_v17 = vld [vmem:[%s731_s0] sm:$0xff] (!%p239_p7)  ;;  %587 = vset.pattern.permute.xlu1 (!%p239_p7), %v612_v18  ;;  %586 = vset.pattern.permute.xlu0 (!%p239_p7), %v612_v18  ;;  %v288_v20 = vld [vmem:[%s731_s0 + $0x8] sm:$0xff] (!%p239_p7)  ;;  %s553_s27 = sshll.u32 (!%p239_p7), %s245_s26, 6  ;;  %v707_v32 = vunpack.c.l.s4 (!%p239_p7), %v613_v31 }
  0x23   : > { %303 = vperm.xlu1 (!%p239_p7), %587, %v299_v16   ;;  %291 = vperm.xlu0 (!%p239_p7), %586, %v287_v17   ;;  %s701_s28 = scalar_lea.vmem (!%p239_p7), [#allocation2], %s553_s27  ;;  %s254_s29 = scalar_lea.vmem (!%p239_p7), [#allocation3], %s553_s27  ;;  %vm465_vm0 = vcmp.lt.s32.totalorder (!%p239_p7), %v451_v33, 256 }
  0x24   : > { %v311_v21 = vld [vmem:[%s701_s28] sm:$0xff] (!%p239_p7)  ;;  %v312_v22 = vld [vmem:[%s701_s28 + $0x8] sm:$0xff] (!%p239_p7)  ;;  %v313_v38 = vld [vmem:[%s701_s28 + $0x10] sm:$0xff] (!%p239_p7)  ;;  %s555_s15 = sshll.u32 (!%p239_p7), %s542_s18, 1 }
  0x25   : > { %v315_v23 = vld [vmem:[%s701_s28 + $0x20] sm:$0xff] (!%p239_p7)  ;;  %v320_v25 = vld [vmem:[%s254_s29 + $0x8] sm:$0xff] (!%p239_p7)  ;;  %v314_v39 = vld [vmem:[%s701_s28 + $0x18] sm:$0xff] (!%p239_p7)  ;;  %p283_p8 = scmp.lt.s32.totalorder (!%p239_p7), %s555_s15, 3 }
  0x26   : > { %v319_v24 = vld [vmem:[%s254_s29] sm:$0xff] (!%p239_p7)  ;;  %v316_v26 = vld [vmem:[%s701_s28 + $0x28] sm:$0xff] (!%p239_p7)  ;;  %v317_v44 = vld [vmem:[%s701_s28 + $0x30] sm:$0xff] (!%p239_p7) }
  0x27   : > { %308 = vperm.xlu1 (!%p239_p7), %587, %v300_v19   ;;  %296 = vperm.xlu0 (!%p239_p7), %586, %v288_v20   ;;  %v323_v27 = vld [vmem:[%s254_s29 + $0x20] sm:$0xff] (!%p239_p7)  ;;  %v324_v28 = vld [vmem:[%s254_s29 + $0x28] sm:$0xff] (!%p239_p7)  ;;  %v321_v45 = vld [vmem:[%s254_s29 + $0x10] sm:$0xff] (!%p239_p7) }
  0x28   : > { %v322_v46 = vld [vmem:[%s254_s29 + $0x18] sm:$0xff] (!%p239_p7)  ;;  %v325_v52 = vld [vmem:[%s254_s29 + $0x30] sm:$0xff] (!%p239_p7) }
  0x29   : > { %v318_v51 = vld [vmem:[%s701_s28 + $0x38] sm:$0xff]  ;;  %s741_s15 = smov (!%p283_p8, %s555_s15), 3 }
  0x2a   : > { %v326_v53 = vld [vmem:[%s254_s29 + $0x38] sm:$0xff]  ;;  %s285_s30 = scalar_lea.vmem %s735_s4, %s741_s15 }
  0xa2   : > { %v304_v29 = vpop.permute.xlu1 %303  ;;  %v292_v30 = vpop.permute.xlu0 %291 }
  0xa3   : > { %v331_v34 = vmul.f32 %v319_v24, %v304_v29  ;;  %v332_v35 = vmul.f32 %v320_v25, %v304_v29  ;;  %v353_v36 = vmul.f32 %v311_v21, %v304_v29  ;;  %v354_v37 = vmul.f32 %v312_v22, %v304_v29 }
  0xa4   : > { %v383_v40 = vmul.f32 %v323_v27, %v304_v29  ;;  %v384_v41 = vmul.f32 %v324_v28, %v304_v29  ;;  %v405_v42 = vmul.f32 %v315_v23, %v304_v29  ;;  %v406_v43 = vmul.f32 %v316_v26, %v304_v29 }
  0xa5   : > { %v327_v47 = vmul.f32 %v311_v21, %v292_v30  ;;  %v328_v48 = vmul.f32 %v312_v22, %v292_v30  ;;  %v357_v49 = vmul.f32 %v319_v24, %v292_v30  ;;  %v358_v50 = vmul.f32 %v320_v25, %v292_v30 }
  0xa6   : > { %v379_v54 = vmul.f32 %v315_v23, %v292_v30  ;;  %v380_v55 = vmul.f32 %v316_v26, %v292_v30  ;;  %v409_v56 = vmul.f32 %v323_v27, %v292_v30  ;;  %v410_v57 = vmul.f32 %v324_v28, %v292_v30  ;;  %v309_v58 = vpop.permute.xlu1 %308  ;;  %v297_v59 = vpop.permute.xlu0 %296 }
  0xa7   : > { %v333_v60 = vmul.f32 %v321_v45, %v309_v58  ;;  %v334_v61 = vmul.f32 %v322_v46, %v309_v58  ;;  %v355_v62 = vmul.f32 %v313_v38, %v309_v58  ;;  %v356_v63 = vmul.f32 %v314_v39, %v309_v58 }
  0xa8   : > { %v385_v0 = vmul.f32 %v325_v52, %v309_v58  ;;  %v386_v1 = vmul.f32 %v326_v53, %v309_v58  ;;  %v407_v2 = vmul.f32 %v317_v44, %v309_v58  ;;  %v408_v3 = vmul.f32 %v318_v51, %v309_v58 }
  0xa9   : > { %v329_v4 = vmul.f32 %v313_v38, %v297_v59  ;;  %v330_v5 = vmul.f32 %v314_v39, %v297_v59  ;;  %v335_v6 = vsub.f32 %v327_v47, %v331_v34  ;;  %v336_v7 = vsub.f32 %v328_v48, %v332_v35 }
  0xaa   : > { %v359_v8 = vmul.f32 %v321_v45, %v297_v59  ;;  %v360_v9 = vmul.f32 %v322_v46, %v297_v59  ;;  %v361_v10 = vadd.f32 %v357_v49, %v353_v36  ;;  %v362_v11 = vadd.f32 %v358_v50, %v354_v37 }
  0xab   : > { %v337_v12 = vsub.f32 %v329_v4, %v333_v60  ;;  %v338_v13 = vsub.f32 %v330_v5, %v334_v61  ;;  %v381_v14 = vmul.f32 %v317_v44, %v297_v59  ;;  %v382_v15 = vmul.f32 %v318_v51, %v297_v59 }
  0xac   : > { %v363_v16 = vadd.f32 %v359_v8, %v355_v62  ;;  %v364_v17 = vadd.f32 %v360_v9, %v356_v63  ;;  %v387_v18 = vsub.f32 %v379_v54, %v383_v40  ;;  %v388_v19 = vsub.f32 %v380_v55, %v384_v41 }
  0xad   : > { %v339_v20 = vadd.f32 %v337_v12, %v335_v6  ;;  %v346_v21 = vadd.f32 %v338_v13, %v336_v7  ;;  %v389_v22 = vsub.f32 %v381_v14, %v385_v0  ;;  %v390_v23 = vsub.f32 %v382_v15, %v386_v1 }
  0xae   : > { %v365_v24 = vadd.f32 %v363_v16, %v361_v10  ;;  %v372_v25 = vadd.f32 %v364_v17, %v362_v11  ;;  %v411_v26 = vmul.f32 %v325_v52, %v297_v59  ;;  %v412_v27 = vmul.f32 %v326_v53, %v297_v59 }
  0xaf   : > { %v340_v28 = vrot.slane %v339_v20, 4  ;;  %v347_v29 = vrot.slane %v346_v21, 4  ;;  %v391_v30 = vadd.f32 %v389_v22, %v387_v18  ;;  %v398_v31 = vadd.f32 %v390_v23, %v388_v19 }
  0xb0   : > { %v366_v34 = vrot.slane %v365_v24, 4  ;;  %v373_v35 = vrot.slane %v372_v25, 4  ;;  %v413_v36 = vadd.f32 %v409_v56, %v405_v42  ;;  %v414_v37 = vadd.f32 %v410_v57, %v406_v43 }
  0xb1   : > { %v341_v38 = vadd.f32 %v340_v28, %v339_v20  ;;  %v348_v39 = vadd.f32 %v347_v29, %v346_v21  ;;  %v392_v40 = vrot.slane %v391_v30, 4  ;;  %v399_v41 = vrot.slane %v398_v31, 4 }
  0xb2   : > { %v367_v44 = vadd.f32 %v366_v34, %v365_v24  ;;  %v374_v45 = vadd.f32 %v373_v35, %v372_v25  ;;  %v415_v46 = vadd.f32 %v411_v26, %v407_v2  ;;  %v416_v47 = vadd.f32 %v412_v27, %v408_v3 }
  0xb3   : > { %v342_v48 = vrot.slane %v341_v38, 2  ;;  %v349_v49 = vrot.slane %v348_v39, 2  ;;  %v393_v50 = vadd.f32 %v392_v40, %v391_v30  ;;  %v400_v51 = vadd.f32 %v399_v41, %v398_v31 }
  0xb4   : > { %v368_v52 = vrot.slane %v367_v44, 2  ;;  %v375_v53 = vrot.slane %v374_v45, 2  ;;  %v417_v54 = vadd.f32 %v415_v46, %v413_v36  ;;  %v424_v55 = vadd.f32 %v416_v47, %v414_v37 }
  0xb5   : > { %v343_v58 = vadd.f32 %v342_v48, %v341_v38  ;;  %v350_v59 = vadd.f32 %v349_v49, %v348_v39  ;;  %v394_v42 = vrot.slane %v393_v50, 2  ;;  %v401_v43 = vrot.slane %v400_v51, 2 }
  0xb6   : > { %v369_v56 = vadd.f32 %v368_v52, %v367_v44  ;;  %v376_v57 = vadd.f32 %v375_v53, %v374_v45  ;;  %v418_v60 = vrot.slane %v417_v54, 4  ;;  %v425_v61 = vrot.slane %v424_v55, 4 }
  0xb7   : > { %v344_v62 = vrot.slane %v343_v58, 1  ;;  %v351_v63 = vrot.slane %v350_v59, 1  ;;  %v395_v0 = vadd.f32 %v394_v42, %v393_v50  ;;  %v402_v1 = vadd.f32 %v401_v43, %v400_v51 }
  0xb8   : > { %v370_v2 = vrot.slane %v369_v56, 1  ;;  %v377_v3 = vrot.slane %v376_v57, 1  ;;  %v419_v4 = vadd.f32 %v418_v60, %v417_v54  ;;  %v426_v5 = vadd.f32 %v425_v61, %v424_v55 }
  0xb9   : > { %v345_v6 = vadd.f32 %v344_v62, %v343_v58  ;;  %v352_v7 = vadd.f32 %v351_v63, %v350_v59  ;;  %v396_v8 = vrot.slane %v395_v0, 1  ;;  %v403_v9 = vrot.slane %v402_v1, 1 }
  0xba   : > { %v371_v10 = vadd.f32 %v370_v2, %v369_v56  ;;  %v378_v11 = vadd.f32 %v377_v3, %v376_v57  ;;  %v420_v12 = vrot.slane %v419_v4, 2  ;;  %v427_v13 = vrot.slane %v426_v5, 2 }
  0xbb   : > { %v397_v14 = vadd.f32 %v396_v8, %v395_v0  ;;  %v404_v15 = vadd.f32 %v403_v9, %v402_v1  ;;  %v431_v16 = vmul.f32 %v345_v6, %v345_v6  ;;  %v432_v17 = vmul.f32 %v352_v7, %v352_v7 }
  0xbc   : > { %v421_v18 = vadd.f32 %v420_v12, %v419_v4  ;;  %v428_v19 = vadd.f32 %v427_v13, %v426_v5  ;;  %v433_v20 = vmul.f32 %v371_v10, %v371_v10  ;;  %v434_v21 = vmul.f32 %v378_v11, %v378_v11 }
  0xbd   : > { %v437_v22 = vmul.f32 %v397_v14, %v397_v14  ;;  %v438_v23 = vmul.f32 %v404_v15, %v404_v15  ;;  %v450_v28 = vunpack.c.0.s8 %v707_v32  ;;  %v452_v29 = vshrl.u32 %v451_v33, 7 }
  0xbe   : > { %v422_v24 = vrot.slane %v421_v18, 1  ;;  %v429_v25 = vrot.slane %v428_v19, 1  ;;  %v435_v26 = vadd.f32 %v433_v20, %v431_v16  ;;  %v436_v27 = vadd.f32 %v434_v21, %v432_v17 }
  0xbf   : > { %v453_v38 = vsub.s32 %v450_v28, %v452_v29 }
  0xc0   : > { %v423_v30 = vadd.f32 %v422_v24, %v421_v18  ;;  %v430_v31 = vadd.f32 %v429_v25, %v428_v19  ;;  %v439_v34 = vadd.f32 %v437_v22, %v435_v26  ;;  %v440_v35 = vadd.f32 %v438_v23, %v436_v27 }
  0xc2   : > { %v441_v36 = vmul.f32 %v423_v30, %v423_v30  ;;  %v442_v37 = vmul.f32 %v430_v31, %v430_v31 }
  0xc4   : > { %v443_v39 = vadd.f32 %v441_v36, %v439_v34  ;;  %v444_v40 = vadd.f32 %v442_v37, %v440_v35 }
  0xc6   : > { %v447_v41 = vcombine.low %v443_v39, %v444_v40 }
  0xc8   : > { %v454_v44 = vrot.slane %v447_v41, %v453_v38 }
  0xca   : > { %v461_v32 = vrot.slane %v454_v44, %v453_v38 }
  0xcc   : > { %467 = vst.msk [vmem:[%s285_s30] sm:$0x3] %vm465_vm0, %v461_v32 }
  0xcd PF: > { %p11_p9 = scmp.ge.s32.totalorder %s656_s19, 4   ;;  %s737_s15 = smov %s606_s16 }
  0xce   : > { %s738_s16 = smov %s665_s22  ;;  %s739_s17 = smov %s656_s19 }
  0xcf   :  { %13 = sbr.rel (!%p11_p9) target bundleno = 2 (0x2), region = 125 }

</bundles_post_ra>
